<compile_context>
chip_gen: v6e
topology: v6e:2x2x1
jax: 0.10.0
libtpu: 0.0.40
codegen_flags: <defaults>
</compile_context>

<pallas_src>
import functools
import math

import jax
import jax.numpy as jnp
from jax.experimental import pallas as pl
from jax.experimental.pallas import tpu as pltpu


# ------------------------------ helpers ------------------------------------ #

def _layernorm_f32(x, g, b):
    """LayerNorm matching torch.nn.LayerNorm (biased variance, eps=1e-5), f32 math."""
    mu = jnp.mean(x, axis=-1, keepdims=True)
    var = jnp.mean((x - mu) ** 2, axis=-1, keepdims=True)
    return (x - mu) * jax.lax.rsqrt(var + 1e-5) * g + b


# ----------------------- fused per-cluster attention ------------------------ #

def _cluster_attn_kernel(x_ref, wqkv_ref, bqkv_ref, wo_ref, bo_ref, o_ref, *,
                         n_heads, d_head, cluster_len, scale):
    """One grid step = one batch element of one cluster.

    x_ref:  [Lc+4, D]   cluster tokens + 4 global tokens
    o_ref:  [Lc,   D]   attention output for the cluster tokens only
    """
    d_model = n_heads * d_head
    x = x_ref[...].astype(jnp.float32)

    # Fused QKV projection (single MXU pass, bf16 inputs, f32 accumulate).
    qkv = jnp.dot(x.astype(jnp.bfloat16),
                  wqkv_ref[...].astype(jnp.bfloat16),
                  preferred_element_type=jnp.float32) + bqkv_ref[...]   # [Lc4, 3D]

    wo = wo_ref[...]
    out = jnp.zeros((x.shape[0], d_model), jnp.float32)

    # Heads handled with static lane slices inside the kernel (no wrapper transposes).
    for h in range(n_heads):
        lo = h * d_head
        q = qkv[:, lo:lo + d_head] * scale                    # scale q, not the LxL scores
        k = qkv[:, d_model + lo:d_model + lo + d_head]
        v = qkv[:, 2 * d_model + lo:2 * d_model + lo + d_head]

        # s = q @ k^T  (contract on d_head; no materialized transpose)
        s = jax.lax.dot_general(q.astype(jnp.bfloat16), k.astype(jnp.bfloat16),
                                (((1,), (1,)), ((), ())),
                                preferred_element_type=jnp.float32)      # [Lc4, Lc4]

        # softmax in f32, divide moved to the EUP slot
        m = jnp.max(s, axis=-1, keepdims=True)
        p = jnp.exp(s - m)
        l = jnp.sum(p, axis=-1, keepdims=True)
        p = p * pl.reciprocal(l, approx=True)

        o_h = jnp.dot(p.astype(jnp.bfloat16), v.astype(jnp.bfloat16),
                      preferred_element_type=jnp.float32)                # [Lc4, dh]

        # Output projection folded in per head:  o @ wo == sum_h o_h @ wo[h*dh:(h+1)*dh]
        out = out + jnp.dot(o_h.astype(jnp.bfloat16),
                            wo[lo:lo + d_head, :].astype(jnp.bfloat16),
                            preferred_element_type=jnp.float32)

    out = out + bo_ref[...]
    # Only the cluster rows are written back (trailing 4 global tokens are dropped).
    o_ref[...] = out[:cluster_len, :].astype(o_ref.dtype)


def cluster_attention(clu_x, wqkv, bqkv, wo, bo, *, n_heads, cluster_len):
    """clu_x: [B, Lc+4, D]  ->  attention output for the cluster rows: [B, Lc, D]."""
    B, l_ctx, d_model = clu_x.shape
    d_head = d_model // n_heads
    scale = 1.0 / math.sqrt(d_head)

    kernel = functools.partial(_cluster_attn_kernel, n_heads=n_heads, d_head=d_head,
                               cluster_len=cluster_len, scale=scale)
    const = lambda b: (0, 0)   # weights: same (full) block every grid step
    return pl.pallas_call(
        kernel,
        grid=(B,),
        out_shape=jax.ShapeDtypeStruct((B, cluster_len, d_model), clu_x.dtype),
        in_specs=[
            pl.BlockSpec((None, l_ctx, d_model), lambda b: (b, 0, 0)),   # squeezed batch dim
            pl.BlockSpec((d_model, 3 * d_model), const),
            pl.BlockSpec((1, 3 * d_model), const),
            pl.BlockSpec((d_model, d_model), const),
            pl.BlockSpec((1, d_model), const),
        ],
        out_specs=pl.BlockSpec((None, cluster_len, d_model), lambda b: (b, 0, 0)),
        compiler_params=pltpu.CompilerParams(
            dimension_semantics=("parallel",)),
    )(clu_x, wqkv, bqkv, wo, bo)


# -------------- fused residual + norm1 + FFN + residual + norm2 -------------- #

def _res_ln_ffn_kernel(x_ref, dx_ref, g1_ref, bn1_ref, w1_ref, b1_ref,
                       w2_ref, b2_ref, g2_ref, bn2_ref, o_ref):
    """One M-tile of the [B*L, D] slab: norm2(h + FFN(h)) where h = norm1(x + dx)."""
    x = x_ref[...].astype(jnp.float32) + dx_ref[...].astype(jnp.float32)  # residual (f32)
    h = _layernorm_f32(x, g1_ref[...], bn1_ref[...])                       # norm1

    # conv1 (kernel=1) + relu + conv2 (kernel=1), bf16 MXU inputs, f32 accumulate.
    y = jnp.dot(h.astype(jnp.bfloat16), w1_ref[...].astype(jnp.bfloat16),
                preferred_element_type=jnp.float32) + b1_ref[...]
    y = jnp.maximum(y, 0.0)
    y = jnp.dot(y.astype(jnp.bfloat16), w2_ref[...].astype(jnp.bfloat16),
                preferred_element_type=jnp.float32) + b2_ref[...]

    o_ref[...] = _layernorm_f32(h + y, g2_ref[...], bn2_ref[...]).astype(o_ref.dtype)


def residual_norm_ffn(x2d, dx2d, params):
    M, D = x2d.shape
    d_ff = params["w1"].shape[1]

    # Pick the largest lane/sublane-friendly M tile that divides M (keeps blocks well
    # under a 64 MiB v7x VMEM budget at production sizes; full M at toy sizes).
    # TODO(synk): for large d_ff add a K ("arbitrary") reduction grid axis with a VMEM
    # f32 accumulator; unnecessary at these weight sizes.
    tm = M
    for cand in (512, 256, 128, 64, 32, 16, 8):
        if M % cand == 0:
            tm = cand
            break

    row = lambda i: (i, 0)
    const = lambda i: (0, 0)
    return pl.pallas_call(
        _res_ln_ffn_kernel,
        grid=(M // tm,),
        out_shape=jax.ShapeDtypeStruct((M, D), x2d.dtype),
        in_specs=[
            pl.BlockSpec((tm, D), row),          # x
            pl.BlockSpec((tm, D), row),          # clu_new_x
            pl.BlockSpec((1, D), const),         # norm1 gamma
            pl.BlockSpec((1, D), const),         # norm1 beta
            pl.BlockSpec((D, d_ff), const),      # conv1 weight (as [D, d_ff])
            pl.BlockSpec((1, d_ff), const),      # conv1 bias
            pl.BlockSpec((d_ff, D), const),      # conv2 weight (as [d_ff, D])
            pl.BlockSpec((1, D), const),         # conv2 bias
            pl.BlockSpec((1, D), const),         # norm2 gamma
            pl.BlockSpec((1, D), const),         # norm2 beta
        ],
        out_specs=pl.BlockSpec((tm, D), row),
        compiler_params=pltpu.CompilerParams(
            dimension_semantics=("parallel",)),
    )(x2d, dx2d,
      params["g1"].reshape(1, D), params["be1"].reshape(1, D),
      params["w1"], params["b1"].reshape(1, d_ff),
      params["w2"], params["b2"].reshape(1, D),
      params["g2"].reshape(1, D), params["be2"].reshape(1, D))


# --------------------------- layer forward pass ----------------------------- #

def expclu_encoder_layer_forward(x, cluster_sizes, params, n_heads):
    """expclu_EncoderLayer.forward (eval mode).

    x:             [B, L, D] with L = sum(cluster_sizes) + 4 (4 trailing global tokens).
    cluster_sizes: tuple of python ints == len(cluster_dict[label]) per label.
    Returns (out [B, L, D], LPF_attn_list).
    """
    B, L, D = x.shape
    assert sum(cluster_sizes) + 4 <= L

    wqkv = params["wqkv"]
    bqkv = params["bqkv"].reshape(1, 3 * D)
    wo = params["wo"]
    bo = params["bo"].reshape(1, D)

    global_tok = x[:, -4:, :]                      # 4 trailing tokens appended to every cluster
    cluster_outs = []
    lpf_attn_list = []
    start = 0
    for c_len in cluster_sizes:
        clu_x = jnp.concatenate([x[:, start:start + c_len, :], global_tok], axis=1)
        new_x = cluster_attention(clu_x, wqkv, bqkv, wo, bo,
                                  n_heads=n_heads, cluster_len=c_len)
        cluster_outs.append(new_x)
        # TODO(synk): injected LPF/HPF attention module is undefined in the spec;
        # instantiated as full softmax MHA, attention maps not materialized (None).
        lpf_attn_list.append(None)
        start += c_len

    # Positions not covered by any cluster (the trailing 4 tokens) keep a zero update,
    # exactly like clu_new_x = zeros_like(x) in the reference.
    tail = L - start
    if tail > 0:
        cluster_outs.append(jnp.zeros((B, tail, D), x.dtype))
    clu_new_x = jnp.concatenate(cluster_outs, axis=1)          # [B, L, D]

    out2d = residual_norm_ffn(x.reshape(B * L, D), clu_new_x.reshape(B * L, D), params)
    return out2d.reshape(B, L, D), lpf_attn_list


# ------------------------------ param init ---------------------------------- #

def init_params(key, d_model, d_ff, n_heads):
    keys = jax.random.split(key, 6)

    def w(k, shape):
        return jax.random.normal(k, shape, jnp.float32) * 0.02

    wq, wk, wv = (w(keys[i], (d_model, d_model)) for i in range(3))
    return {
        # fused QKV projection weight [D, 3D] (one MXU pass instead of three)
        "wqkv": jnp.concatenate([wq, wk, wv], axis=1),
        "bqkv": jnp.zeros((3 * d_model,), jnp.float32),
        "wo": w(keys[3], (d_model, d_model)), "bo": jnp.zeros((d_model,), jnp.float32),
        "w1": w(keys[4], (d_model, d_ff)),    "b1": jnp.zeros((d_ff,), jnp.float32),
        "w2": w(keys[5], (d_ff, d_model)),    "b2": jnp.zeros((d_model,), jnp.float32),
        "g1": jnp.ones((d_model,), jnp.float32), "be1": jnp.zeros((d_model,), jnp.float32),
        "g2": jnp.ones((d_model,), jnp.float32), "be2": jnp.zeros((d_model,), jnp.float32),
    }


# --------------------------------- main -------------------------------------- #

if __name__ == "__main__":
    B, D = 2, 32
    n_heads, d_ff = 4, 64
    cluster_sizes = (5, 3)              # len(cluster_dict[label]) for each label
    L = sum(cluster_sizes) + 4          # + 4 trailing global tokens

    key = jax.random.PRNGKey(0)
    kx, kp = jax.random.split(key)
    x = jax.random.normal(kx, (B, L, D), jnp.float32)
    params = init_params(kp, D, d_ff, n_heads)

    out, lpf_attns = expclu_encoder_layer_forward(x, cluster_sizes, params, n_heads)
    out = jax.block_until_ready(out)

    assert out.shape == (B, L, D)
    assert len(lpf_attns) == len(cluster_sizes)
    print("KERNEL_OK")
</pallas_src>

<mosaic_0001>
module attributes {stable_mosaic.version = 11 : i64} {
  func.func @_cluster_attn_kernel(%arg0: i32, %arg1: memref<1x9x32xf32, #tpu.memory_space<vmem>>, %arg2: memref<32x96xf32, #tpu.memory_space<vmem>>, %arg3: memref<1x96xf32, #tpu.memory_space<vmem>>, %arg4: memref<32x32xf32, #tpu.memory_space<vmem>>, %arg5: memref<1x32xf32, #tpu.memory_space<vmem>>, %arg6: memref<1x5x32xf32, #tpu.memory_space<vmem>>) attributes {dimension_semantics = [#tpu.dimension_semantics<parallel>], iteration_bounds = array<i64: 2>, scalar_prefetch = 0 : i64, scratch_operands = 0 : i64, tpu.core_type = #tpu.core_type<tc>, window_params = [{transform_indices = @transform_0, window_bounds = array<i64: 1, 9, 32>}, {pipeline_mode = #tpu.pipeline_mode<synchronous>, transform_indices = @transform_1, window_bounds = array<i64: 32, 96>}, {pipeline_mode = #tpu.pipeline_mode<synchronous>, transform_indices = @transform_2, window_bounds = array<i64: 1, 96>}, {pipeline_mode = #tpu.pipeline_mode<synchronous>, transform_indices = @transform_3, window_bounds = array<i64: 32, 32>}, {pipeline_mode = #tpu.pipeline_mode<synchronous>, transform_indices = @transform_4, window_bounds = array<i64: 1, 32>}, {transform_indices = @transform_5, window_bounds = array<i64: 1, 5, 32>}]} {
    %c0 = arith.constant 0 : index
    %c0_0 = arith.constant 0 : index
    %c0_1 = arith.constant 0 : index
    %0 = vector.load %arg1[%c0, %c0_0, %c0_1] : memref<1x9x32xf32, #tpu.memory_space<vmem>>, vector<1x9x32xf32>
    %1 = vector.shape_cast %0 : vector<1x9x32xf32> to vector<9x32xf32>
    %2 = arith.truncf %1 : vector<9x32xf32> to vector<9x32xbf16>
    %c0_2 = arith.constant 0 : index
    %c0_3 = arith.constant 0 : index
    %3 = vector.load %arg2[%c0_2, %c0_3] : memref<32x96xf32, #tpu.memory_space<vmem>>, vector<32x96xf32>
    %4 = arith.truncf %3 : vector<32x96xf32> to vector<32x96xbf16>
    %cst = arith.constant dense<0.000000e+00> : vector<9x96xf32>
    %5 = tpu.matmul %2, %4, %cst {dimension_numbers = #tpu.dot_dimension_numbers<[1], [0], [0], [1], [0, 0, 1, 1], [], []>} : vector<9x32xbf16>, vector<32x96xbf16>, vector<9x96xf32> -> vector<9x96xf32>
    %c0_4 = arith.constant 0 : index
    %c0_5 = arith.constant 0 : index
    %6 = vector.load %arg3[%c0_4, %c0_5] : memref<1x96xf32, #tpu.memory_space<vmem>>, vector<1x96xf32>
    %7 = vector.broadcast %6 : vector<1x96xf32> to vector<9x96xf32>
    %8 = arith.addf %5, %7 : vector<9x96xf32>
    %c0_6 = arith.constant 0 : index
    %c0_7 = arith.constant 0 : index
    %9 = vector.load %arg4[%c0_6, %c0_7] : memref<32x32xf32, #tpu.memory_space<vmem>>, vector<32x32xf32>
    %cst_8 = arith.constant 0.000000e+00 : f32
    %10 = vector.broadcast %cst_8 : f32 to vector<9x32xf32>
    %11 = vector.extract_strided_slice %8 {offsets = [0, 0], sizes = [9, 8], strides = [1, 1]} : vector<9x96xf32> to vector<9x8xf32>
    %cst_9 = arith.constant 0.353553385 : f32
    %12 = vector.broadcast %cst_9 : f32 to vector<9x8xf32>
    %13 = arith.mulf %11, %12 : vector<9x8xf32>
    %14 = vector.extract_strided_slice %8 {offsets = [0, 32], sizes = [9, 8], strides = [1, 1]} : vector<9x96xf32> to vector<9x8xf32>
    %15 = vector.extract_strided_slice %8 {offsets = [0, 64], sizes = [9, 8], strides = [1, 1]} : vector<9x96xf32> to vector<9x8xf32>
    %16 = arith.truncf %13 : vector<9x8xf32> to vector<9x8xbf16>
    %17 = arith.truncf %14 : vector<9x8xf32> to vector<9x8xbf16>
    %cst_10 = arith.constant dense<0.000000e+00> : vector<9x9xf32>
    %18 = tpu.matmul %16, %17, %cst_10 {dimension_numbers = #tpu.dot_dimension_numbers<[1], [1], [0], [0], [0, 0, 1, 0], [], []>} : vector<9x8xbf16>, vector<9x8xbf16>, vector<9x9xf32> -> vector<9x9xf32>
    %cst_11 = arith.constant dense<0xFF800000> : vector<9xf32>
    %19 = vector.multi_reduction <maximumf>, %18, %cst_11 [1] : vector<9x9xf32> to vector<9xf32>
    %20 = vector.shape_cast %19 : vector<9xf32> to vector<9x1xf32>
    %21 = vector.broadcast %20 : vector<9x1xf32> to vector<9x9xf32>
    %22 = arith.subf %18, %21 : vector<9x9xf32>
    %23 = math.exp %22 : vector<9x9xf32>
    %cst_12 = arith.constant dense<0.000000e+00> : vector<9xf32>
    %24 = vector.multi_reduction <add>, %23, %cst_12 [1] : vector<9x9xf32> to vector<9xf32>
    %25 = vector.shape_cast %24 : vector<9xf32> to vector<9x1xf32>
    %26 = tpu.reciprocal %25 {approx = true} : vector<9x1xf32> -> vector<9x1xf32>
    %27 = vector.broadcast %26 : vector<9x1xf32> to vector<9x9xf32>
    %28 = arith.mulf %23, %27 : vector<9x9xf32>
    %29 = arith.truncf %28 : vector<9x9xf32> to vector<9x9xbf16>
    %30 = arith.truncf %15 : vector<9x8xf32> to vector<9x8xbf16>
    %cst_13 = arith.constant dense<0.000000e+00> : vector<9x8xf32>
    %31 = tpu.matmul %29, %30, %cst_13 {dimension_numbers = #tpu.dot_dimension_numbers<[1], [0], [0], [1], [0, 0, 1, 1], [], []>} : vector<9x9xbf16>, vector<9x8xbf16>, vector<9x8xf32> -> vector<9x8xf32>
    %32 = arith.truncf %31 : vector<9x8xf32> to vector<9x8xbf16>
    %33 = vector.extract_strided_slice %9 {offsets = [0, 0], sizes = [8, 32], strides = [1, 1]} : vector<32x32xf32> to vector<8x32xf32>
    %34 = arith.truncf %33 : vector<8x32xf32> to vector<8x32xbf16>
    %cst_14 = arith.constant dense<0.000000e+00> : vector<9x32xf32>
    %35 = tpu.matmul %32, %34, %cst_14 {dimension_numbers = #tpu.dot_dimension_numbers<[1], [0], [0], [1], [0, 0, 1, 1], [], []>} : vector<9x8xbf16>, vector<8x32xbf16>, vector<9x32xf32> -> vector<9x32xf32>
    %36 = arith.addf %10, %35 : vector<9x32xf32>
    %37 = vector.extract_strided_slice %8 {offsets = [0, 8], sizes = [9, 8], strides = [1, 1]} : vector<9x96xf32> to vector<9x8xf32>
    %cst_15 = arith.constant 0.353553385 : f32
    %38 = vector.broadcast %cst_15 : f32 to vector<9x8xf32>
    %39 = arith.mulf %37, %38 : vector<9x8xf32>
    %40 = vector.extract_strided_slice %8 {offsets = [0, 40], sizes = [9, 8], strides = [1, 1]} : vector<9x96xf32> to vector<9x8xf32>
    %41 = vector.extract_strided_slice %8 {offsets = [0, 72], sizes = [9, 8], strides = [1, 1]} : vector<9x96xf32> to vector<9x8xf32>
    %42 = arith.truncf %39 : vector<9x8xf32> to vector<9x8xbf16>
    %43 = arith.truncf %40 : vector<9x8xf32> to vector<9x8xbf16>
    %cst_16 = arith.constant dense<0.000000e+00> : vector<9x9xf32>
    %44 = tpu.matmul %42, %43, %cst_16 {dimension_numbers = #tpu.dot_dimension_numbers<[1], [1], [0], [0], [0, 0, 1, 0], [], []>} : vector<9x8xbf16>, vector<9x8xbf16>, vector<9x9xf32> -> vector<9x9xf32>
    %cst_17 = arith.constant dense<0xFF800000> : vector<9xf32>
    %45 = vector.multi_reduction <maximumf>, %44, %cst_17 [1] : vector<9x9xf32> to vector<9xf32>
    %46 = vector.shape_cast %45 : vector<9xf32> to vector<9x1xf32>
    %47 = vector.broadcast %46 : vector<9x1xf32> to vector<9x9xf32>
    %48 = arith.subf %44, %47 : vector<9x9xf32>
    %49 = math.exp %48 : vector<9x9xf32>
    %cst_18 = arith.constant dense<0.000000e+00> : vector<9xf32>
    %50 = vector.multi_reduction <add>, %49, %cst_18 [1] : vector<9x9xf32> to vector<9xf32>
    %51 = vector.shape_cast %50 : vector<9xf32> to vector<9x1xf32>
    %52 = tpu.reciprocal %51 {approx = true} : vector<9x1xf32> -> vector<9x1xf32>
    %53 = vector.broadcast %52 : vector<9x1xf32> to vector<9x9xf32>
    %54 = arith.mulf %49, %53 : vector<9x9xf32>
    %55 = arith.truncf %54 : vector<9x9xf32> to vector<9x9xbf16>
    %56 = arith.truncf %41 : vector<9x8xf32> to vector<9x8xbf16>
    %cst_19 = arith.constant dense<0.000000e+00> : vector<9x8xf32>
    %57 = tpu.matmul %55, %56, %cst_19 {dimension_numbers = #tpu.dot_dimension_numbers<[1], [0], [0], [1], [0, 0, 1, 1], [], []>} : vector<9x9xbf16>, vector<9x8xbf16>, vector<9x8xf32> -> vector<9x8xf32>
    %58 = arith.truncf %57 : vector<9x8xf32> to vector<9x8xbf16>
    %59 = vector.extract_strided_slice %9 {offsets = [8, 0], sizes = [8, 32], strides = [1, 1]} : vector<32x32xf32> to vector<8x32xf32>
    %60 = arith.truncf %59 : vector<8x32xf32> to vector<8x32xbf16>
    %cst_20 = arith.constant dense<0.000000e+00> : vector<9x32xf32>
    %61 = tpu.matmul %58, %60, %cst_20 {dimension_numbers = #tpu.dot_dimension_numbers<[1], [0], [0], [1], [0, 0, 1, 1], [], []>} : vector<9x8xbf16>, vector<8x32xbf16>, vector<9x32xf32> -> vector<9x32xf32>
    %62 = arith.addf %36, %61 : vector<9x32xf32>
    %63 = vector.extract_strided_slice %8 {offsets = [0, 16], sizes = [9, 8], strides = [1, 1]} : vector<9x96xf32> to vector<9x8xf32>
    %cst_21 = arith.constant 0.353553385 : f32
    %64 = vector.broadcast %cst_21 : f32 to vector<9x8xf32>
    %65 = arith.mulf %63, %64 : vector<9x8xf32>
    %66 = vector.extract_strided_slice %8 {offsets = [0, 48], sizes = [9, 8], strides = [1, 1]} : vector<9x96xf32> to vector<9x8xf32>
    %67 = vector.extract_strided_slice %8 {offsets = [0, 80], sizes = [9, 8], strides = [1, 1]} : vector<9x96xf32> to vector<9x8xf32>
    %68 = arith.truncf %65 : vector<9x8xf32> to vector<9x8xbf16>
    %69 = arith.truncf %66 : vector<9x8xf32> to vector<9x8xbf16>
    %cst_22 = arith.constant dense<0.000000e+00> : vector<9x9xf32>
    %70 = tpu.matmul %68, %69, %cst_22 {dimension_numbers = #tpu.dot_dimension_numbers<[1], [1], [0], [0], [0, 0, 1, 0], [], []>} : vector<9x8xbf16>, vector<9x8xbf16>, vector<9x9xf32> -> vector<9x9xf32>
    %cst_23 = arith.constant dense<0xFF800000> : vector<9xf32>
    %71 = vector.multi_reduction <maximumf>, %70, %cst_23 [1] : vector<9x9xf32> to vector<9xf32>
    %72 = vector.shape_cast %71 : vector<9xf32> to vector<9x1xf32>
    %73 = vector.broadcast %72 : vector<9x1xf32> to vector<9x9xf32>
    %74 = arith.subf %70, %73 : vector<9x9xf32>
    %75 = math.exp %74 : vector<9x9xf32>
    %cst_24 = arith.constant dense<0.000000e+00> : vector<9xf32>
    %76 = vector.multi_reduction <add>, %75, %cst_24 [1] : vector<9x9xf32> to vector<9xf32>
    %77 = vector.shape_cast %76 : vector<9xf32> to vector<9x1xf32>
    %78 = tpu.reciprocal %77 {approx = true} : vector<9x1xf32> -> vector<9x1xf32>
    %79 = vector.broadcast %78 : vector<9x1xf32> to vector<9x9xf32>
    %80 = arith.mulf %75, %79 : vector<9x9xf32>
    %81 = arith.truncf %80 : vector<9x9xf32> to vector<9x9xbf16>
    %82 = arith.truncf %67 : vector<9x8xf32> to vector<9x8xbf16>
    %cst_25 = arith.constant dense<0.000000e+00> : vector<9x8xf32>
    %83 = tpu.matmul %81, %82, %cst_25 {dimension_numbers = #tpu.dot_dimension_numbers<[1], [0], [0], [1], [0, 0, 1, 1], [], []>} : vector<9x9xbf16>, vector<9x8xbf16>, vector<9x8xf32> -> vector<9x8xf32>
    %84 = arith.truncf %83 : vector<9x8xf32> to vector<9x8xbf16>
    %85 = vector.extract_strided_slice %9 {offsets = [16, 0], sizes = [8, 32], strides = [1, 1]} : vector<32x32xf32> to vector<8x32xf32>
    %86 = arith.truncf %85 : vector<8x32xf32> to vector<8x32xbf16>
    %cst_26 = arith.constant dense<0.000000e+00> : vector<9x32xf32>
    %87 = tpu.matmul %84, %86, %cst_26 {dimension_numbers = #tpu.dot_dimension_numbers<[1], [0], [0], [1], [0, 0, 1, 1], [], []>} : vector<9x8xbf16>, vector<8x32xbf16>, vector<9x32xf32> -> vector<9x32xf32>
    %88 = arith.addf %62, %87 : vector<9x32xf32>
    %89 = vector.extract_strided_slice %8 {offsets = [0, 24], sizes = [9, 8], strides = [1, 1]} : vector<9x96xf32> to vector<9x8xf32>
    %cst_27 = arith.constant 0.353553385 : f32
    %90 = vector.broadcast %cst_27 : f32 to vector<9x8xf32>
    %91 = arith.mulf %89, %90 : vector<9x8xf32>
    %92 = vector.extract_strided_slice %8 {offsets = [0, 56], sizes = [9, 8], strides = [1, 1]} : vector<9x96xf32> to vector<9x8xf32>
    %93 = vector.extract_strided_slice %8 {offsets = [0, 88], sizes = [9, 8], strides = [1, 1]} : vector<9x96xf32> to vector<9x8xf32>
    %94 = arith.truncf %91 : vector<9x8xf32> to vector<9x8xbf16>
    %95 = arith.truncf %92 : vector<9x8xf32> to vector<9x8xbf16>
    %cst_28 = arith.constant dense<0.000000e+00> : vector<9x9xf32>
    %96 = tpu.matmul %94, %95, %cst_28 {dimension_numbers = #tpu.dot_dimension_numbers<[1], [1], [0], [0], [0, 0, 1, 0], [], []>} : vector<9x8xbf16>, vector<9x8xbf16>, vector<9x9xf32> -> vector<9x9xf32>
    %cst_29 = arith.constant dense<0xFF800000> : vector<9xf32>
    %97 = vector.multi_reduction <maximumf>, %96, %cst_29 [1] : vector<9x9xf32> to vector<9xf32>
    %98 = vector.shape_cast %97 : vector<9xf32> to vector<9x1xf32>
    %99 = vector.broadcast %98 : vector<9x1xf32> to vector<9x9xf32>
    %100 = arith.subf %96, %99 : vector<9x9xf32>
    %101 = math.exp %100 : vector<9x9xf32>
    %cst_30 = arith.constant dense<0.000000e+00> : vector<9xf32>
    %102 = vector.multi_reduction <add>, %101, %cst_30 [1] : vector<9x9xf32> to vector<9xf32>
    %103 = vector.shape_cast %102 : vector<9xf32> to vector<9x1xf32>
    %104 = tpu.reciprocal %103 {approx = true} : vector<9x1xf32> -> vector<9x1xf32>
    %105 = vector.broadcast %104 : vector<9x1xf32> to vector<9x9xf32>
    %106 = arith.mulf %101, %105 : vector<9x9xf32>
    %107 = arith.truncf %106 : vector<9x9xf32> to vector<9x9xbf16>
    %108 = arith.truncf %93 : vector<9x8xf32> to vector<9x8xbf16>
    %cst_31 = arith.constant dense<0.000000e+00> : vector<9x8xf32>
    %109 = tpu.matmul %107, %108, %cst_31 {dimension_numbers = #tpu.dot_dimension_numbers<[1], [0], [0], [1], [0, 0, 1, 1], [], []>} : vector<9x9xbf16>, vector<9x8xbf16>, vector<9x8xf32> -> vector<9x8xf32>
    %110 = arith.truncf %109 : vector<9x8xf32> to vector<9x8xbf16>
    %111 = vector.extract_strided_slice %9 {offsets = [24, 0], sizes = [8, 32], strides = [1, 1]} : vector<32x32xf32> to vector<8x32xf32>
    %112 = arith.truncf %111 : vector<8x32xf32> to vector<8x32xbf16>
    %cst_32 = arith.constant dense<0.000000e+00> : vector<9x32xf32>
    %113 = tpu.matmul %110, %112, %cst_32 {dimension_numbers = #tpu.dot_dimension_numbers<[1], [0], [0], [1], [0, 0, 1, 1], [], []>} : vector<9x8xbf16>, vector<8x32xbf16>, vector<9x32xf32> -> vector<9x32xf32>
    %114 = arith.addf %88, %113 : vector<9x32xf32>
    %c0_33 = arith.constant 0 : index
    %c0_34 = arith.constant 0 : index
    %115 = vector.load %arg5[%c0_33, %c0_34] : memref<1x32xf32, #tpu.memory_space<vmem>>, vector<1x32xf32>
    %116 = vector.broadcast %115 : vector<1x32xf32> to vector<9x32xf32>
    %117 = arith.addf %114, %116 : vector<9x32xf32>
    %118 = vector.extract_strided_slice %117 {offsets = [0, 0], sizes = [5, 32], strides = [1, 1]} : vector<9x32xf32> to vector<5x32xf32>
    %c0_35 = arith.constant 0 : index
    %c0_36 = arith.constant 0 : index
    %c0_37 = arith.constant 0 : index
    %119 = vector.load %arg6[%c0_35, %c0_36, %c0_37] : memref<1x5x32xf32, #tpu.memory_space<vmem>>, vector<1x5x32xf32>
    %120 = vector.shape_cast %119 : vector<1x5x32xf32> to vector<5x32xf32>
    %121 = vector.shape_cast %118 : vector<5x32xf32> to vector<1x5x32xf32>
    tpu.vector_store %arg6[%c0_35, %c0_36, %c0_37], %121 {strides = array<i32>} : memref<1x5x32xf32, #tpu.memory_space<vmem>>, vector<1x5x32xf32>,
    return
  }
  func.func @transform_0(%arg0: i32) -> (i32, i32, i32) {
    %c0_i32 = arith.constant 0 : i32
    %c0_i32_0 = arith.constant 0 : i32
    %c0_i32_1 = arith.constant 0 : i32
    return %arg0, %c0_i32, %c0_i32_0 : i32, i32, i32
  }
  func.func @transform_1(%arg0: i32) -> (i32, i32) {
    %c0_i32 = arith.constant 0 : i32
    %c0_i32_0 = arith.constant 0 : i32
    %c0_i32_1 = arith.constant 0 : i32
    return %c0_i32, %c0_i32_0 : i32, i32
  }
  func.func @transform_2(%arg0: i32) -> (i32, i32) {
    %c0_i32 = arith.constant 0 : i32
    %c0_i32_0 = arith.constant 0 : i32
    %c0_i32_1 = arith.constant 0 : i32
    return %c0_i32, %c0_i32_0 : i32, i32
  }
  func.func @transform_3(%arg0: i32) -> (i32, i32) {
    %c0_i32 = arith.constant 0 : i32
    %c0_i32_0 = arith.constant 0 : i32
    %c0_i32_1 = arith.constant 0 : i32
    return %c0_i32, %c0_i32_0 : i32, i32
  }
  func.func @transform_4(%arg0: i32) -> (i32, i32) {
    %c0_i32 = arith.constant 0 : i32
    %c0_i32_0 = arith.constant 0 : i32
    %c0_i32_1 = arith.constant 0 : i32
    return %c0_i32, %c0_i32_0 : i32, i32
  }
  func.func @transform_5(%arg0: i32) -> (i32, i32, i32) {
    %c0_i32 = arith.constant 0 : i32
    %c0_i32_0 = arith.constant 0 : i32
    %c0_i32_1 = arith.constant 0 : i32
    return %arg0, %c0_i32, %c0_i32_0 : i32, i32, i32
  }
}

</mosaic_0001>

<bundles_post_ra>
// kernel: tpu_custom_call.1
= control target key start
LH: loop header
LB: loop body
LE: loop exit
PB: predicated region body
PF: predicated region fallthrough
CT: control target
= control target key end

     0   :  { %10 = vsyncpa [#allocation3], 0  ;;  %s1363_s18 = smov 0   ;;  %s1526_s0 = inlined_call_operand.vmem [shape: f32[2,9,32], index: 0, kind: input, shape index: {}]   ;;  %s1527_s1 = inlined_call_operand.vmem [shape: f32[32,96], index: 1, kind: input, shape index: {}]   ;;  %s1528_s2 = inlined_call_operand.vmem [shape: f32[1,96], index: 2, kind: input, shape index: {}]   ;;  %s1529_s3 = inlined_call_operand.hbm [shape: f32[32,32], index: 3, kind: input, shape index: {}]   ;;  %s1530_s4 = inlined_call_operand.vmem [shape: f32[1,32], index: 4, kind: input, shape index: {}]   ;;  %s1531_s5 = inlined_call_operand.vmem [shape: f32[2,5,32], index: 5, kind: output, shape index: {}]  }
   0x1 LB: > { %s1369_s19 = sadd.s32 4294967295, %s1314_s18   ;;  %p1078_p0 = scmp.ge.s32.totalorder %s1314_s18, 1  ;;  %s1314_s18 = sphi %s1363_s18, %s16_s18  }
   0x2   : > { %p157_p1 = scmp.lt.s32.totalorder %s1314_s18, 3  ;;  %s1316_s20 = smov [#allocation2]  }
   0x3   : > { %s175_s21 = sshll.u32 %s1316_s20, 4  ;;  %p1219_p3 = scmp.eq.s32.totalorder %s1369_s19, 0  ;;  %s176_s21 = int_to_ptr.vmem [resolvable:$true] %s175_s21 }
   0x4   : > { %p1373_p2 = pnand %p1078_p0, %p157_p1  ;;  %s1289_s23 = scalar_lea.vmem %s176_s21, 512 }
   0x5   : > { %p1290_p7 = scmp.ne.s32.totalorder %s176_s21, %s1289_s23  ;;  %p1297_p10 = scmp.lt.s32.totalorder %s176_s21, %s176_s21 }
   0x6   : > { %p1215_p4 = pneg %p1373_p2  ;;  %p1298_p11 = scmp.lt.s32.totalorder %s1289_s23, %s1289_s23 }
   0x8   : > { %p1216_p5 = pnand %p1219_p3, %p1215_p4  ;;  %p1299_p12 = por %p1298_p11, %p1297_p10 }
   0xa   : > { %p1280_p6 = pneg %p1216_p5 }
   0xc   : > { %p1292_p8 = pnand %p1290_p7, %p1280_p6 }
   0xe   : > { %p1293_p9 = pneg %p1292_p8 }
  0x10   : > { %p1300_p13 = pnand %p1299_p12, %p1293_p9 }
  0x12   : > { %1303 = shalt.err (!%p1300_p13)
}
  0x13   : > { %s1317_s24 = smov 128   ;;  %s1318_s25 = smov 8  }
  0x14   : > { %1218 = dma.hbm_to_vmem [thread:$0]  (!%p1216_p5), %s1529_s3, 512, %s176_s21, [#allocation3], %s1317_s24, %s1317_s24, %s1318_s25  }
  0x15   : > { %202 = sbr.rel (%p1373_p2) target bundleno = 2516 (0x9d4), region = 40 }
  0x1a   : > { %1309 = dma.done.wait (%p1219_p3), [#allocation3], 512  }
  0x1b   : > { %1311 = vsyncadd (%p1219_p3), [#allocation3], 4294966784  ;;  %p229_p0 = scmp.lt.s32.totalorder %s1369_s19, 1  ;;  %v1319_v0 = vmov 0.0   ;;  %vm1320_vm0 = vmmov 0   ;;  %v244_v1 = vld [vmem:[%s1527_s1 + $0x10] sm:$0xff] }
  0x1c   : > { %1131 = vmatprep.subr.bf16.mxu0 %v1319_v0  ;;  %1135 = vmatprep.mubr.msk.bf16.mxu0 %vm1320_vm0, %v1319_v0  ;;  %v245_v2 = vld [vmem:[%s1527_s1 + $0x18] sm:$0xff]  ;;  %v242_v3 = vld [vmem:[%s1527_s1] sm:$0xff]  ;;  %v243_v5 = vld [vmem:[%s1527_s1 + $0x8] sm:$0xff]  ;;  %vm255_vm1 = vcmask 261120   ;;  %s1321_s17 = smov 96   ;;  %s1322_s20 = smov 120  }
  0x1d   : > { %s1534_s19 = smov (!%p229_p0, %s1369_s19), 1  ;;  %1139 = vmatprep.subr.bf16.mxu1 %v1319_v0  ;;  %1141 = vmatprep.mubr.msk.bf16.mxu1 %vm1320_vm0, %v1319_v0  ;;  %v247_v4 = vpack.c.bf16 %v245_v2, %v244_v1  ;;  %v246_v6 = vpack.c.bf16 %v243_v5, %v242_v3  ;;  %v1086_v10 = vld [vmem:[%s1528_s2] ss:$0 sm:$0xff]  ;;  %s1323_s21 = smov 88   ;;  %vm311_vm2 = vcmask 64512   ;;  %vm359_vm3 = vcmask 72704  }
  0x1e   : > { %s1103_s28 = sshll.u32 %s1534_s19, 4  ;;  %vm363_vm4 = vcmask 65536   ;;  %s1324_s22 = smov 56   ;;  %vm389_vm5 = vcmask 1043456   ;;  %vm390_vm6 = vcmask 1044480   ;;  %v1328_v60 = vmov 65535  }
  0x1f   : > { %s233_s12 = scalar_lea.vmem %s1526_s0, %s1103_s28  ;;  %1132 = vmatpush3.bf16.msra.mxu0 %v247_v4  ;;  %s1325_s23 = smov 64   ;;  %v391_v61 = vsel %vm389_vm5, 4294967295, %v1328_v60  ;;  %vm1009_vm7 = vcmask 258048  }
  0x20   : > { %v239_v7 = vld [vmem:[%s233_s12] sm:$0xff]  ;;  %v240_v8 = vld [vmem:[%s233_s12 + $0x8] sm:$0x1]  ;;  %1133 = vmatprep.subr.bf16.mxu0 %v1319_v0  ;;  %s1326_s24 = smov 80   ;;  %s1327_s25 = smov 112   ;;  %v1455_v63 = vsel %vm390_vm6, %v391_v61, 0 }
  0x21   : > { %v241_v9 = vpack.c.bf16 %v240_v8, %v239_v7  ;;  %s1329_s26 = smov 72   ;;  %s1330_s27 = smov 48  }
  0x22   : > { %s1331_s28 = smov 104   ;;  %s1332_s29 = smov 40  }
  0x23   : > { %1134 = vmatpush3.bf16.msra.mxu0 %v246_v6  ;;  %s1085_s30 = sshll.u32 %s1534_s19, 3 }
  0x24   : > { %1145 = vmatprep.subr.bf16.mxu0 %v1319_v0  ;;  %s237_s10 = scalar_lea.vmem %s1531_s5, %s1085_s30 }
  0x26   : > { %1136 = vmatmul.mubr.msk.bf16.vlgmr.msra.gmra.mxu0 %vm255_vm1, %v241_v9 }
  0x27   : > { %1147 = vmatprep.mubr.msk.bf16.mxu0 %vm1320_vm0, %v1319_v0 }
  0xe6   : > { %v293_v11 = vpop.f32.mrf.mxu0 }
  0xe7   : > { %v294_v13 = vadd.f32 %v1086_v10, %v293_v11 }
  0xe8   : > { %v1137_v12 = vpop.f32.mrf.mxu0 }
  0xe9   : > { %v304_v17 = vmul.f32 0.35355338, %v294_v13 }
  0xea   : > { %v296_v14 = vpop.f32.mrf.mxu0 }
  0xeb   : > { %v297_v15 = vadd.f32 %v1086_v10, %v296_v14 }
  0xec   : > { %v1138_v16 = vpop.f32.mrf.mxu0 }
  0xed   : > { %v305_v18 = vmul.f32 0.35355338, %v297_v15  ;;  %v1424_v19 = vpack.c.bf16 %v297_v15, %v294_v13  ;;  %v300_v16 = vld [vmem:[#allocation2] sm:$0xff] }
  0xef   : > { %v1426_v20 = vpack.c.bf16 %v305_v18, %v304_v17  ;;  %309 = vrot.lane.b32.xlu0 %v1424_v19, %s1321_s17  ;;  %v438_v17 = vpack.c.bf16 %v300_v16, %v300_v16 }
  0xf1   : > { %440 = vrot.lane.b32.xlu1 %v1426_v20, %s1322_s20  ;;  %v615_v18 = vsel %vm389_vm5, %v438_v17, 0 }
  0xf3   : > { %442 = vrot.lane.b32.xlu0 %v1424_v19, %s1323_s21 }
 0x161   : > { %v310_v21 = vpop.permute.xlu0 %309 }
 0x162   : > { %v316_v22 = vsel %vm311_vm2, %v310_v21, 0  ;;  %v301_v21 = vld [vmem:[#allocation2 + $0x8] sm:$0xff] }
 0x163   : > { %1140 = vmatpush3.bf16.xpose.msra.mxu1 %v316_v22  ;;  %v441_v25 = vpop.permute.xlu1 %440  ;;  %v564_v22 = vpack.c.bf16 %v301_v21, %v301_v21 }
 0x164   : > { %1151 = vmatprep.subr.bf16.mxu1 %v1319_v0 }
 0x165   : > { %v443_v23 = vpop.permute.xlu0 %442 }
 0x166   : > { %v448_v24 = vsel %vm311_vm2, %v443_v23, 0  ;;  %v569_v23 = vsel %vm389_vm5, %v564_v22, 0 }
 0x16a   : > { %1142 = vmatmul.mubr.msk.bf16.vlgmr.msra.gmra.mxu1 %vm311_vm2, %v1426_v20 }
 0x16b   : > { %1152 = vmatpush3.bf16.xpose.msra.mxu1 %v448_v24  ;;  %1153 = vmatprep.mubr.msk.bf16.mxu1 %vm1320_vm0, %v1319_v0 }
 0x16c   : > { %1163 = vmatprep.subr.bf16.mxu1 %v1319_v0 }
 0x172   : > { %1154 = vmatmul.mubr.msk.bf16.vlgmr.msra.gmra.mxu1 %vm311_vm2, %v441_v25 }
 0x173   : > { %1165 = vmatprep.mubr.msk.bf16.mxu1 %vm1320_vm0, %v1319_v0  ;;  %1164 = vmatpush3.bf16.msra.mxu1 %v569_v23 }
 0x174   : > { %1175 = vmatprep.subr.bf16.mxu1 %v1319_v0 }
 0x22a   : > { %v352_v26 = vpop.f32.mrf.mxu1 }
 0x22b   : > { %v360_v27 = vsel %vm359_vm3, %v352_v26, -inf }
 0x22c   : > { %361 = vmax.xlane.f32.xlu1 %v360_v27  ;;  %v1143_v28 = vpop.f32.mrf.mxu1 }
 0x22e   : > { %v355_v29 = vpop.f32.mrf.mxu1 }
 0x22f   : > { %v364_v30 = vsel %vm363_vm4, %v355_v29, -inf }
 0x230   : > { %365 = vmax.xlane.f32.xlu0 %v364_v30  ;;  %v1144_v31 = vpop.f32.mrf.mxu1 }
 0x232   : > { %v484_v32 = vpop.f32.mrf.mxu1 }
 0x233   : > { %v491_v33 = vsel %vm359_vm3, %v484_v32, -inf }
 0x234   : > { %492 = vmax.xlane.f32.xlu0 %v491_v33  ;;  %v1155_v34 = vpop.f32.mrf.mxu1 }
 0x236   : > { %v487_v35 = vpop.f32.mrf.mxu1 }
 0x237   : > { %v494_v36 = vsel %vm363_vm4, %v487_v35, -inf }
 0x238   : > { %495 = vmax.xlane.f32.xlu1 %v494_v36  ;;  %v1156_v37 = vpop.f32.mrf.mxu1 }
 0x2b5   : > { %v362_v38 = vpop.xlane.xlu1 %361 }
 0x2b6   : > { %v367_v39 = vsub.f32 %v352_v26, %v362_v38 }
 0x2b8   : > { %v369_v40 = vmul.f32 1.442695, %v367_v39 }
 0x2b9   : > { %v366_v41 = vpop.xlane.xlu0 %365 }
 0x2ba   : > { %1246 = vpow2.f32 %v369_v40  ;;  %v368_v42 = vsub.f32 %v355_v29, %v366_v41 }
 0x2bc   : > { %v371_v43 = vmul.f32 1.442695, %v368_v42 }
 0x2bd   : > { %v493_v44 = vpop.xlane.xlu0 %492 }
 0x2be   : > { %1248 = vpow2.f32 %v371_v43  ;;  %v497_v45 = vsub.f32 %v484_v32, %v493_v44 }
 0x2c0   : > { %v499_v46 = vmul.f32 1.442695, %v497_v45 }
 0x2c1   : > { %v496_v47 = vpop.xlane.xlu1 %495 }
 0x2c2   : > { %1250 = vpow2.f32 %v499_v46  ;;  %v498_v48 = vsub.f32 %v487_v35, %v496_v47 }
 0x2c4   : > { %v501_v49 = vmul.f32 1.442695, %v498_v48 }
 0x2c6   : > { %1252 = vpow2.f32 %v501_v49 }
 0x2c7   : > { %v1247_v50 = vpop.eup %1246 }
 0x2c8   : > { %v373_v51 = vsel %vm359_vm3, %v1247_v50, 0.0 }
 0x2c9   : > { %374 = vadd.xlane.f32.xlu0 %v373_v51 }
 0x2cb   : > { %v1249_v52 = vpop.eup %1248 }
 0x2cc   : > { %v376_v53 = vsel %vm363_vm4, %v1249_v52, 0.0 }
 0x2cd   : > { %377 = vadd.xlane.f32.xlu1 %v376_v53 }
 0x2cf   : > { %v1251_v54 = vpop.eup %1250 }
 0x2d0   : > { %v503_v55 = vsel %vm359_vm3, %v1251_v54, 0.0 }
 0x2d1   : > { %504 = vadd.xlane.f32.xlu0 %v503_v55 }
 0x2d3   : > { %v1253_v56 = vpop.eup %1252 }
 0x2d4   : > { %v506_v57 = vsel %vm363_vm4, %v1253_v56, 0.0 }
 0x2d5   : > { %507 = vadd.xlane.f32.xlu1 %v506_v57 }
 0x2e6   : > { %514 = vrot.lane.b32.xlu1 %v1424_v19, %s1324_s22 }
 0x2e7   : > { %384 = vrot.lane.b32.xlu0 %v1424_v19, %s1325_s23 }
 0x2ea   : > { %659 = vrot.lane.b32.xlu1 %v1424_v19, %s1326_s24 }
 0x2eb   : > { %657 = vrot.lane.b32.xlu0 %v1426_v20, %s1327_s25 }
 0x352   : > { %v375_v58 = vpop.xlane.xlu0 %374 }
 0x353   : > { %1254 = vrcp.f32 %v375_v58 }
 0x356   : > { %v378_v59 = vpop.xlane.xlu1 %377 }
 0x357   : > { %1256 = vrcp.f32 %v378_v59 }
 0x35a   : > { %v505_v62 = vpop.xlane.xlu0 %504 }
 0x35b   : > { %1258 = vrcp.f32 %v505_v62 }
 0x35e   : > { %v385_v1 = vpop.permute.xlu0 %384  ;;  %v508_v2 = vpop.xlane.xlu1 %507 }
 0x35f   : > { %v394_v3 = vand.u32 %v1455_v63, %v385_v1  ;;  %1260 = vrcp.f32 %v508_v2 }
 0x360   : > { %v1255_v4 = vpop.eup %1254 }
 0x361   : > { %1146 = vmatpush3.bf16.msra.mxu0 %v394_v3  ;;  %v381_v7 = vmul.f32 %v1255_v4, %v1247_v50 }
 0x362   : > { %1157 = vmatprep.subr.bf16.mxu0 %v1319_v0  ;;  %v515_v6 = vpop.permute.xlu1 %514  ;;  %v658_v36 = vpop.permute.xlu0 %657 }
 0x363   : > { %v520_v10 = vand.u32 %v515_v6, %v1455_v63 }
 0x364   : > { %v1257_v5 = vpop.eup %1256 }
 0x365   : > { %v382_v8 = vmul.f32 %v1257_v5, %v1249_v52 }
 0x366   : > { %v660_v31 = vpop.permute.xlu1 %659 }
 0x367   : > { %v383_v9 = vpack.c.bf16 %v382_v8, %v381_v7  ;;  %v665_v35 = vsel %vm311_vm2, %v660_v31, 0 }
 0x368   : > { %v1259_v11 = vpop.eup %1258 }
 0x369   : > { %1148 = vmatmul.mubr.msk.bf16.vlgmr.msra.gmra.mxu0 %vm359_vm3, %v383_v9  ;;  %v511_v13 = vmul.f32 %v1259_v11, %v1251_v54  ;;  %v302_v11 = vld [vmem:[#allocation2 + $0x10] sm:$0xff] }
 0x36a   : > { %1158 = vmatpush3.bf16.msra.mxu0 %v520_v10  ;;  %1159 = vmatprep.mubr.msk.bf16.mxu0 %vm1320_vm0, %v1319_v0 }
 0x36b   : > { %1169 = vmatprep.subr.bf16.mxu0 %v1319_v0 }
 0x36c   : > { %v1261_v12 = vpop.eup %1260 }
 0x36d   : > { %v512_v14 = vmul.f32 %v1261_v12, %v1253_v56  ;;  %v781_v12 = vpack.c.bf16 %v302_v11, %v302_v11 }
 0x36f   : > { %v513_v15 = vpack.c.bf16 %v512_v14, %v511_v13  ;;  %v786_v13 = vsel %vm389_vm5, %v781_v12, 0 }
 0x371   : > { %1160 = vmatmul.mubr.msk.bf16.vlgmr.msra.gmra.mxu0 %vm359_vm3, %v513_v15 }
 0x372   : > { %1171 = vmatprep.mubr.msk.bf16.mxu0 %vm1320_vm0, %v1319_v0  ;;  %1170 = vmatpush3.bf16.msra.mxu0 %v615_v18 }
 0x373   : > { %1181 = vmatprep.subr.bf16.mxu0 %v1319_v0 }
 0x429   : > { %v430_v24 = vpop.f32.mrf.mxu0 }
 0x42b   : > { %v1149_v25 = vpop.f32.mrf.mxu0 }
 0x42d   : > { %v433_v26 = vpop.f32.mrf.mxu0 }
 0x42e   : > { %v437_v27 = vpack.c.bf16 %v433_v26, %v430_v24 }
 0x42f   : > { %v1150_v28 = vpop.f32.mrf.mxu0 }
 0x430   : > { %1172 = vmatmul.mubr.msk.bf16.vlgmr.msra.gmra.mxu0 %vm311_vm2, %v437_v27 }
 0x431   : > { %v556_v29 = vpop.f32.mrf.mxu0  ;;  %1183 = vmatprep.mubr.msk.bf16.mxu0 %vm1320_vm0, %v1319_v0 }
 0x433   : > { %v1161_v30 = vpop.f32.mrf.mxu0 }
 0x435   : > { %v559_v32 = vpop.f32.mrf.mxu0 }
 0x436   : > { %v563_v33 = vpack.c.bf16 %v559_v32, %v556_v29 }
 0x437   : > { %v1162_v34 = vpop.f32.mrf.mxu0 }
 0x438   : > { %1166 = vmatmul.mubr.msk.bf16.vlgmr.msra.gmra.mxu1 %vm311_vm2, %v563_v33 }
 0x439   : > { %1176 = vmatpush3.bf16.xpose.msra.mxu1 %v665_v35  ;;  %1177 = vmatprep.mubr.msk.bf16.mxu1 %vm1320_vm0, %v1319_v0 }
 0x43a   : > { %1187 = vmatprep.subr.bf16.mxu1 %v1319_v0 }
 0x440   : > { %1178 = vmatmul.mubr.msk.bf16.vlgmr.msra.gmra.mxu1 %vm311_vm2, %v658_v36 }
 0x441   : > { %1189 = vmatprep.mubr.msk.bf16.mxu1 %vm1320_vm0, %v1319_v0  ;;  %1188 = vmatpush3.bf16.msra.mxu1 %v786_v13 }
 0x442   : > { %1199 = vmatprep.subr.bf16.mxu1 %v1319_v0 }
 0x4f0   : > { %v651_v37 = vpop.f32.mrf.mxu0 }
 0x4f2   : > { %v1173_v38 = vpop.f32.mrf.mxu0 }
 0x4f4   : > { %v654_v39 = vpop.f32.mrf.mxu0 }
 0x4f6   : > { %v1174_v40 = vpop.f32.mrf.mxu0 }
 0x4f8   : > { %v605_v41 = vpop.f32.mrf.mxu1 }
 0x4f9   : > { %v1482_v42 = vadd.f32 %v651_v37, %v605_v41 }
 0x4fa   : > { %v1167_v43 = vpop.f32.mrf.mxu1 }
 0x4fc   : > { %v608_v44 = vpop.f32.mrf.mxu1 }
 0x4fe   : > { %v1168_v45 = vpop.f32.mrf.mxu1 }
 0x500   : > { %v701_v46 = vpop.f32.mrf.mxu1 }
 0x501   : > { %v708_v47 = vsel %vm359_vm3, %v701_v46, -inf }
 0x502   : > { %709 = vmax.xlane.f32.xlu1 %v708_v47  ;;  %v1179_v48 = vpop.f32.mrf.mxu1 }
 0x504   : > { %v704_v49 = vpop.f32.mrf.mxu1 }
 0x505   : > { %v711_v50 = vsel %vm363_vm4, %v704_v49, -inf }
 0x506   : > { %712 = vmax.xlane.f32.xlu0 %v711_v50  ;;  %v1180_v51 = vpop.f32.mrf.mxu1 }
 0x58b   : > { %v710_v52 = vpop.xlane.xlu1 %709 }
 0x58c   : > { %v714_v53 = vsub.f32 %v701_v46, %v710_v52 }
 0x58e   : > { %v716_v54 = vmul.f32 1.442695, %v714_v53 }
 0x58f   : > { %v713_v55 = vpop.xlane.xlu0 %712 }
 0x590   : > { %1262 = vpow2.f32 %v716_v54  ;;  %v715_v56 = vsub.f32 %v704_v49, %v713_v55  ;;  %v303_v49 = vld [vmem:[#allocation2 + $0x18] sm:$0xff] }
 0x591   : > { %v953_v50 = vpack.c.bf16 %v303_v49, %v303_v49 }
 0x592   : > { %v718_v57 = vmul.f32 1.442695, %v715_v56 }
 0x593   : > { %v958_v51 = vsel %vm389_vm5, %v953_v50, 0 }
 0x594   : > { %1264 = vpow2.f32 %v718_v57  ;;  %v1100_v57 = vld [vmem:[%s1530_s4] ss:$0 sm:$0xff] }
 0x59d   : > { %v1263_v58 = vpop.eup %1262 }
 0x59e   : > { %v720_v59 = vsel %vm359_vm3, %v1263_v58, 0.0 }
 0x59f   : > { %721 = vadd.xlane.f32.xlu0 %v720_v59 }
 0x5a1   : > { %v1265_v60 = vpop.eup %1264 }
 0x5a2   : > { %v723_v61 = vsel %vm363_vm4, %v1265_v60, 0.0 }
 0x5a3   : > { %724 = vadd.xlane.f32.xlu1 %v723_v61 }
 0x5b4   : > { %831 = vrot.lane.b32.xlu1 %v1424_v19, %s1329_s26 }
 0x5b5   : > { %731 = vrot.lane.b32.xlu0 %v1424_v19, %s1330_s27 }
 0x5b8   : > { %829 = vrot.lane.b32.xlu1 %v1426_v20, %s1331_s28 }
 0x628   : > { %v722_v62 = vpop.xlane.xlu0 %721 }
 0x629   : > { %1266 = vrcp.f32 %v722_v62 }
 0x62c   : > { %v725_v1 = vpop.xlane.xlu1 %724  ;;  %v732_v2 = vpop.permute.xlu0 %731 }
 0x62d   : > { %1268 = vrcp.f32 %v725_v1  ;;  %v737_v3 = vand.u32 %v732_v2, %v1455_v63 }
 0x62f   : > { %1182 = vmatpush3.bf16.msra.mxu0 %v737_v3 }
 0x630   : > { %1193 = vmatprep.subr.bf16.mxu0 %v1319_v0  ;;  %v832_v8 = vpop.permute.xlu1 %831 }
 0x631   : > { %v837_v10 = vsel %vm311_vm2, %v832_v8, 0 }
 0x634   : > { %v830_v20 = vpop.permute.xlu1 %829 }
 0x636   : > { %v1267_v4 = vpop.eup %1266 }
 0x637   : > { %v728_v6 = vmul.f32 %v1267_v4, %v1263_v58 }
 0x63a   : > { %v1269_v5 = vpop.eup %1268 }
 0x63b   : > { %v729_v7 = vmul.f32 %v1269_v5, %v1265_v60 }
 0x63d   : > { %v730_v9 = vpack.c.bf16 %v729_v7, %v728_v6 }
 0x63f   : > { %1184 = vmatmul.mubr.msk.bf16.vlgmr.msra.gmra.mxu0 %vm359_vm3, %v730_v9 }
 0x640   : > { %1194 = vmatpush3.bf16.xpose.msra.mxu0 %v837_v10  ;;  %1195 = vmatprep.mubr.msk.bf16.mxu0 %vm1320_vm0, %v1319_v0 }
 0x641   : > { %1205 = vmatprep.subr.bf16.mxu0 %v1319_v0 }
 0x647   : > { %1196 = vmatmul.mubr.msk.bf16.vlgmr.msra.gmra.mxu0 %vm311_vm2, %v830_v20 }
 0x648   : > { %1207 = vmatprep.mubr.msk.bf16.mxu0 %vm1320_vm0, %v1319_v0  ;;  %1206 = vmatpush3.bf16.msra.mxu0 %v958_v51 }
 0x6ff   : > { %v773_v14 = vpop.f32.mrf.mxu0 }
 0x701   : > { %v1185_v15 = vpop.f32.mrf.mxu0 }
 0x703   : > { %v776_v16 = vpop.f32.mrf.mxu0 }
 0x704   : > { %v780_v17 = vpack.c.bf16 %v776_v16, %v773_v14 }
 0x705   : > { %v1186_v18 = vpop.f32.mrf.mxu0 }
 0x706   : > { %1190 = vmatmul.mubr.msk.bf16.vlgmr.msra.gmra.mxu1 %vm311_vm2, %v780_v17 }
 0x707   : > { %v873_v21 = vpop.f32.mrf.mxu0  ;;  %1201 = vmatprep.mubr.msk.bf16.mxu1 %vm1320_vm0, %v1319_v0 }
 0x708   : > { %v880_v22 = vsel %vm359_vm3, %v873_v21, -inf }
 0x709   : > { %881 = vmax.xlane.f32.xlu0 %v880_v22  ;;  %v1197_v23 = vpop.f32.mrf.mxu0 }
 0x70b   : > { %v876_v24 = vpop.f32.mrf.mxu0 }
 0x70c   : > { %v883_v25 = vsel %vm363_vm4, %v876_v24, -inf }
 0x70d   : > { %884 = vmax.xlane.f32.xlu1 %v883_v25  ;;  %v1198_v26 = vpop.f32.mrf.mxu0 }
 0x71e   : > { %903 = vrot.lane.b32.xlu1 %v1424_v19, %s1332_s29 }
 0x792   : > { %v882_v27 = vpop.xlane.xlu0 %881 }
 0x793   : > { %v886_v28 = vsub.f32 %v873_v21, %v882_v27 }
 0x795   : > { %v888_v29 = vmul.f32 1.442695, %v886_v28 }
 0x796   : > { %v885_v30 = vpop.xlane.xlu1 %884 }
 0x797   : > { %1270 = vpow2.f32 %v888_v29  ;;  %v887_v31 = vsub.f32 %v876_v24, %v885_v30 }
 0x799   : > { %v890_v32 = vmul.f32 1.442695, %v887_v31 }
 0x79a   : > { %v904_v0 = vpop.permute.xlu1 %903 }
 0x79b   : > { %1272 = vpow2.f32 %v890_v32  ;;  %v909_v33 = vand.u32 %v904_v0, %v1455_v63 }
 0x79d   : > { %1200 = vmatpush3.bf16.msra.mxu1 %v909_v33 }
 0x7a4   : > { %v1271_v34 = vpop.eup %1270 }
 0x7a5   : > { %v892_v35 = vsel %vm359_vm3, %v1271_v34, 0.0 }
 0x7a6   : > { %893 = vadd.xlane.f32.xlu0 %v892_v35 }
 0x7a8   : > { %v1273_v36 = vpop.eup %1272 }
 0x7a9   : > { %v895_v37 = vsel %vm363_vm4, %v1273_v36, 0.0 }
 0x7aa   : > { %896 = vadd.xlane.f32.xlu0 %v895_v37 }
 0x7c6   : > { %v822_v19 = vpop.f32.mrf.mxu1 }
 0x7c7   : > { %v828_v38 = vadd.f32 %v822_v19, %v1482_v42 }
 0x7c8   : > { %v1191_v39 = vpop.f32.mrf.mxu1 }
 0x7ca   : > { %v825_v40 = vpop.f32.mrf.mxu1 }
 0x7cc   : > { %v1192_v41 = vpop.f32.mrf.mxu1 }
 0x82f   : > { %v894_v43 = vpop.xlane.xlu0 %893 }
 0x830   : > { %1274 = vrcp.f32 %v894_v43 }
 0x833   : > { %v897_v44 = vpop.xlane.xlu0 %896 }
 0x834   : > { %1276 = vrcp.f32 %v897_v44 }
 0x83d   : > { %v1275_v63 = vpop.eup %1274 }
 0x83e   : > { %v900_v47 = vmul.f32 %v1275_v63, %v1271_v34 }
 0x841   : > { %v1277_v45 = vpop.eup %1276 }
 0x842   : > { %v901_v46 = vmul.f32 %v1277_v45, %v1273_v36 }
 0x844   : > { %v902_v48 = vpack.c.bf16 %v901_v46, %v900_v47 }
 0x846   : > { %1202 = vmatmul.mubr.msk.bf16.vlgmr.msra.gmra.mxu1 %vm359_vm3, %v902_v48 }
 0x906   : > { %v945_v42 = vpop.f32.mrf.mxu1 }
 0x908   : > { %v1203_v52 = vpop.f32.mrf.mxu1 }
 0x90a   : > { %v948_v53 = vpop.f32.mrf.mxu1 }
 0x90b   : > { %v952_v54 = vpack.c.bf16 %v948_v53, %v945_v42 }
 0x90c   : > { %v1204_v55 = vpop.f32.mrf.mxu1 }
 0x90d   : > { %1208 = vmatmul.mubr.msk.bf16.vlgmr.msra.gmra.mxu0 %vm311_vm2, %v952_v54 }
 0x9cd   : > { %v994_v56 = vpop.f32.mrf.mxu0 }
 0x9ce   : > { %v1000_v58 = vadd.f32 %v994_v56, %v828_v38 }
 0x9cf   : > { %v1209_v59 = vpop.f32.mrf.mxu0 }
 0x9d0   : > { %v1008_v60 = vadd.f32 %v1100_v57, %v1000_v58 }
 0x9d1   : > { %v997_v61 = vpop.f32.mrf.mxu0 }
 0x9d2   : > { %1010 = vst.msk [vmem:[%s237_s10] sm:$0x1f] %vm1009_vm7, %v1008_v60 }
 0x9d3   : > { %v1210_v62 = vpop.f32.mrf.mxu0 }
 0x9d4 PF: > { %s16_s18 = sadd.s32 1, %s1314_s18  }
 0x9d5   : > { %p13_p1 = scmp.ge.s32.totalorder %s16_s18, 4  }
 0x9d7   :  { %15 = sbr.rel (!%p13_p1) target bundleno = 1 (0x1), region = 75 }
 0x9dc   :  { %1030 = vsyncpa [#allocation3], 1 }
 0x9dd   :  { %1032 = vsyncpa [#allocation3 + $0x1], 1 }

</bundles_post_ra>
